<compile_context>
chip_gen: v7x
topology: tpu7x:2x2x1
jax: 0.10.0
libtpu: 0.0.40
codegen_flags: <defaults>
</compile_context>

<pallas_src>
import jax
import jax.numpy as jnp
from jax import lax
from jax.experimental import pallas as pl
from jax.experimental.pallas import tpu as pltpu

EPS = 1e-12


def alias_kernel(x_ref, w_ref, b_ref, wf_ref, ws_ref, bf_ref, bs_ref,
                 full_ref, short_ref):
    """One grid step: a (Bt, S, H) slab of encoder states -> lane-dense head probs.

    x_ref   : (Bt, S, H) encoder hidden states (f32 or bf16; upcast to f32)
    w_ref   : (Bt, 1, H) per-example conditional LN weight (w_ln + cond @ Wg)
    b_ref   : (Bt, 1, H) per-example conditional LN bias   (b_ln + cond @ Wb)
    wf_ref  : (2, H) full-head weight (out_features x in_features)
    ws_ref  : (2, H) short-head weight
    bf_ref  : (2, 1) full-head bias column
    bs_ref  : (2, 1) short-head bias column
    full_ref  : (2, Bt*S) sigmoid(full head), batch*sequence flattened on lanes
    short_ref : (2, Bt*S) sigmoid(short head)
    """
    x = x_ref[...].astype(jnp.float32)                      # (Bt, S, H)
    Bt, S, H = x.shape
    M = Bt * S
    x2 = x.reshape(M, H)                                    # layout-free when S % 8 == 0

    # ---- Conditional LayerNorm (TF style: eps inside the sqrt) ----
    # Lane reductions ride the ~idle MXU instead of the XLU: mean(x) and mean(xc^2)
    # are (M,H)x(H,1) matmuls.  Two-pass form (subtract the mean first) avoids the
    # E[x^2]-E[x]^2 cancellation risk; rsqrt goes to the EUP slot.
    inv_h = jnp.full((H, 1), 1.0 / H, dtype=jnp.float32)
    u = jnp.dot(x2, inv_h, preferred_element_type=jnp.float32)        # (M, 1)
    xc = x2 - u
    s = jnp.dot(xc * xc, inv_h, preferred_element_type=jnp.float32)   # (M, 1)
    xn = xc * lax.rsqrt(s + EPS)                                      # (M, H)
    ctx = (w_ref[...] * xn.reshape(Bt, S, H) + b_ref[...]).reshape(M, H)

    # ---- Heads: contract H on BOTH operands so each head lands lane-dense (2, M) ----
    # (replaces the lane-sparse (M, 4) logits + per-batch (S,4)->(4,S) XLU transposes)
    dn = (((1,), (1,)), ((), ()))
    full_t = lax.dot_general(wf_ref[...].astype(jnp.float32), x2, dn,
                             preferred_element_type=jnp.float32)      # (2, M)
    short_t = lax.dot_general(ws_ref[...].astype(jnp.float32), ctx, dn,
                              preferred_element_type=jnp.float32)     # (2, M)

    # Bias add, sigmoid and the stores are all lane-dense over M.
    full_ref[...] = jax.nn.sigmoid(full_t + bf_ref[...])
    short_ref[...] = jax.nn.sigmoid(short_t + bs_ref[...])


def _vmem_plan():
    """Generation-aware budgets: (vmem_limit_bytes, block_budget_bytes, n_tensorcores)."""
    mib = 1024 * 1024
    cap = 128 * mib
    try:  # trace-time hardware query; fall back to 128 MiB-class if unavailable
        cap = int(pltpu.get_tpu_info().vmem_capacity_bytes)
    except Exception:
        pass
    if cap >= 96 * mib:
        # v5e / v6e: 128 MiB VMEM, single TensorCore -> big blocks, generous limit.
        return 100 * mib, 72 * mib, 1
    # v7x-class: 64 MiB per TensorCore, 2 TCs per chip -> leave compiler headroom.
    return 44 * mib, 20 * mib, 2


def _pick_block_b(B, S, H, in_itemsize, block_budget, n_tc):
    """Largest per-step batch block whose *total* in-kernel footprint fits the budget.

    Counts the double-buffered DMA blocks AND the f32 intermediates the kernel body
    materializes (x upcast, xc, xn, ctx), not just the raw input tile."""
    per_ex = (2 * S * H * in_itemsize      # hidden block, double-buffered
              + 4 * S * H * 4              # f32 intermediates: x, xc, xn, ctx
              + 2 * 2 * H * 4              # per-example LN weight + bias, double-buffered
              + 2 * 2 * 2 * S * 4          # two (2, S)-per-example output blocks, x2
              + 2 * 2 * S * 4)             # (2, M) head logits
    cap = max(1, block_budget // per_ex)
    if n_tc > 1 and B >= 4 * n_tc:
        # Megacore (v7x): keep an even number (>= 2 per core) of grid steps so both
        # TensorCores get balanced work and the first DMA is hidden.
        cap = min(cap, max(1, B // (2 * n_tc)))
    bb = max(1, min(B, cap))
    while B % bb:                          # batch divisibility
        bb -= 1
    # Flat (2, B*S) outputs: a *partial* block's lane extent must be a multiple of 128
    # (a full-array block is always allowed).  Always holds for BERT seq lens.
    if bb != B and (bb * S) % 128 != 0:
        valid = [b for b in range(bb, 0, -1) if B % b == 0 and (b * S) % 128 == 0]
        bb = valid[0] if valid else B
    return bb


def alias_model_forward(hidden, input_full, params, *, block_b=None):
    """Training-mode forward of AliasModel (post-BERT part).

    hidden:     (B, S, H) encoder hidden states (float32 or bfloat16)
    input_full: (B, 2) int32 start/end indices
    returns (full_pred, short_pred), each (B, S, 2) float32
    """
    B, S, H = hidden.shape
    wb, wg, w_ln, b_ln, wf, bf, ws, bs = params

    # ---- hoisted out of the kernel: gather + conditional-LN parameter modulation ----
    bidx = jnp.arange(B)
    start_enc = hidden[bidx, input_full[:, 0], :].astype(jnp.float32)   # (B, H)
    end_enc = hidden[bidx, input_full[:, 1], :].astype(jnp.float32)     # (B, H)
    cond = jnp.concatenate([start_enc, end_enc], axis=-1)               # (B, 2H)
    ln_weight = (w_ln + cond @ wg)[:, None, :]                          # (B, 1, H)
    ln_bias = (b_ln + cond @ wb)[:, None, :]                            # (B, 1, H)

    wf_t = jnp.transpose(wf)                                            # (2, H)
    ws_t = jnp.transpose(ws)                                            # (2, H)
    bf_col = bf.reshape(2, 1)
    bs_col = bs.reshape(2, 1)

    vmem_limit, block_budget, n_tc = _vmem_plan()
    if block_b is None:
        block_b = _pick_block_b(B, S, H, hidden.dtype.itemsize, block_budget, n_tc)
    assert B % block_b == 0, (B, block_b)
    assert block_b == B or (block_b * S) % 128 == 0, (block_b, S)

    grid_spec = pltpu.PrefetchScalarGridSpec(
        num_scalar_prefetch=0,
        grid=(B // block_b,),
        in_specs=[
            pl.BlockSpec((block_b, S, H), lambda i: (i, 0, 0)),   # hidden
            pl.BlockSpec((block_b, 1, H), lambda i: (i, 0, 0)),   # LN weight (per ex.)
            pl.BlockSpec((block_b, 1, H), lambda i: (i, 0, 0)),   # LN bias (per ex.)
            pl.BlockSpec((2, H), lambda i: (0, 0)),               # full head W
            pl.BlockSpec((2, H), lambda i: (0, 0)),               # short head W
            pl.BlockSpec((2, 1), lambda i: (0, 0)),               # full head bias
            pl.BlockSpec((2, 1), lambda i: (0, 0)),               # short head bias
        ],
        out_specs=[
            pl.BlockSpec((2, block_b * S), lambda i: (0, i)),     # full probs (lane-dense)
            pl.BlockSpec((2, block_b * S), lambda i: (0, i)),     # short probs
        ],
    )

    full_flat, short_flat = pl.pallas_call(
        alias_kernel,
        out_shape=(jax.ShapeDtypeStruct((2, B * S), jnp.float32),
                   jax.ShapeDtypeStruct((2, B * S), jnp.float32)),
        grid_spec=grid_spec,
        compiler_params=pltpu.CompilerParams(
            dimension_semantics=("parallel",),
            vmem_limit_bytes=vmem_limit),
    )(hidden, ln_weight, ln_bias, wf_t, ws_t, bf_col, bs_col)

    # Cheap wrapper-side un-flatten back to the module's (B, S, 2) outputs.
    full_pred = jnp.transpose(full_flat.reshape(2, B, S), (1, 2, 0))
    short_pred = jnp.transpose(short_flat.reshape(2, B, S), (1, 2, 0))
    return full_pred, short_pred


def reference_forward(hidden, input_full, params):
    """Pure-JAX reference mirroring the PyTorch semantics."""
    wb, wg, w_ln, b_ln, wf, bf, ws, bs = params
    hidden = hidden.astype(jnp.float32)
    B = hidden.shape[0]
    bidx = jnp.arange(B)
    start_enc = hidden[bidx, input_full[:, 0], :]
    end_enc = hidden[bidx, input_full[:, 1], :]
    cond = jnp.concatenate([start_enc, end_enc], axis=-1)[:, None, :]   # (B,1,2H)

    beta = cond @ wb                      # (B,1,H)
    gamma = cond @ wg
    weight = w_ln + gamma                 # (B,1,H)
    bias = b_ln + beta
    u = hidden.mean(-1, keepdims=True)
    s = ((hidden - u) ** 2).mean(-1, keepdims=True)
    xn = (hidden - u) / jnp.sqrt(s + EPS)
    ctx = weight * xn + bias

    full_pred = jax.nn.sigmoid(hidden @ wf + bf)    # (B,S,2)
    short_pred = jax.nn.sigmoid(ctx @ ws + bs)      # (B,S,2)
    return full_pred, short_pred


def init_params(key, H):
    """Deterministic parameter init matching the module's __init__ shapes.

    Linear weights are stored transposed: (in_features, out_features)."""
    k = jax.random.split(key, 6)
    wb = jax.random.normal(k[0], (2 * H, H), jnp.float32) * 0.02  # beta_dense (no bias)
    wg = jax.random.normal(k[1], (2 * H, H), jnp.float32) * 0.02  # gamma_dense (no bias)
    w_ln = jnp.ones((1, H), jnp.float32)                          # LN weight init = ones
    b_ln = jnp.zeros((1, H), jnp.float32)                         # LN bias init = zeros
    wf = jax.random.normal(k[2], (H, 2), jnp.float32) * 0.02      # full head
    bf = jax.random.normal(k[3], (1, 2), jnp.float32) * 0.02
    ws = jax.random.normal(k[4], (H, 2), jnp.float32) * 0.02      # short head
    bs = jax.random.normal(k[5], (1, 2), jnp.float32) * 0.02
    return wb, wg, w_ln, b_ln, wf, bf, ws, bs


def _run_case(B, S, H, key, block_b=None):
    k_hidden, k_idx, k_params = jax.random.split(key, 3)
    hidden = jax.random.normal(k_hidden, (B, S, H), jnp.float32)
    starts = jax.random.randint(k_idx, (B,), 0, S // 2)
    input_full = jnp.stack([starts, starts + 2], axis=-1).astype(jnp.int32)
    params = init_params(k_params, H)

    full_pred, short_pred = alias_model_forward(hidden, input_full, params,
                                                block_b=block_b)
    jax.block_until_ready((full_pred, short_pred))

    full_ref, short_ref = reference_forward(hidden, input_full, params)
    assert full_pred.shape == (B, S, 2) and short_pred.shape == (B, S, 2)
    assert jnp.allclose(full_pred, full_ref, atol=1e-5), "full head mismatch"
    assert jnp.allclose(short_pred, short_ref, atol=1e-5), "short head mismatch"


if __name__ == "__main__":
    key = jax.random.PRNGKey(0)
    k0, k1 = jax.random.split(key)

    # Small single-step case (whole batch in one block; output block == full array).
    _run_case(B=2, S=8, H=32, key=k0)

    # Multi-step grid case: block_b=1, S=128 -> lane-aligned partial output blocks,
    # exercising the batch-blocked pipeline and index maps.
    _run_case(B=2, S=128, H=32, key=k1, block_b=1)

    print("KERNEL_OK")
</pallas_src>

<mosaic_0001>
module attributes {stable_mosaic.version = 11 : i64} {
  func.func @alias_kernel(%arg0: i32, %arg1: memref<2x8x32xf32, #tpu.memory_space<vmem>>, %arg2: memref<2x1x32xf32, #tpu.memory_space<vmem>>, %arg3: memref<2x1x32xf32, #tpu.memory_space<vmem>>, %arg4: memref<2x32xf32, #tpu.memory_space<vmem>>, %arg5: memref<2x32xf32, #tpu.memory_space<vmem>>, %arg6: memref<2x1xf32, #tpu.memory_space<vmem>>, %arg7: memref<2x1xf32, #tpu.memory_space<vmem>>, %arg8: memref<2x16xf32, #tpu.memory_space<vmem>>, %arg9: memref<2x16xf32, #tpu.memory_space<vmem>>) attributes {dimension_semantics = [#tpu.dimension_semantics<parallel>], iteration_bounds = array<i64: 1>, scalar_prefetch = 0 : i64, scratch_operands = 0 : i64, tpu.core_type = #tpu.core_type<tc>, window_params = [{transform_indices = @transform_0, window_bounds = array<i64: 2, 8, 32>}, {transform_indices = @transform_1, window_bounds = array<i64: 2, 1, 32>}, {transform_indices = @transform_2, window_bounds = array<i64: 2, 1, 32>}, {pipeline_mode = #tpu.pipeline_mode<synchronous>, transform_indices = @transform_3, window_bounds = array<i64: 2, 32>}, {pipeline_mode = #tpu.pipeline_mode<synchronous>, transform_indices = @transform_4, window_bounds = array<i64: 2, 32>}, {pipeline_mode = #tpu.pipeline_mode<synchronous>, transform_indices = @transform_5, window_bounds = array<i64: 2, 1>}, {pipeline_mode = #tpu.pipeline_mode<synchronous>, transform_indices = @transform_6, window_bounds = array<i64: 2, 1>}, {transform_indices = @transform_7, window_bounds = array<i64: 2, 16>}, {transform_indices = @transform_8, window_bounds = array<i64: 2, 16>}]} {
    %c0 = arith.constant 0 : index
    %c0_0 = arith.constant 0 : index
    %c0_1 = arith.constant 0 : index
    %0 = vector.load %arg1[%c0, %c0_0, %c0_1] : memref<2x8x32xf32, #tpu.memory_space<vmem>>, vector<2x8x32xf32>
    %1 = vector.shape_cast %0 : vector<2x8x32xf32> to vector<16x32xf32>
    %cst = arith.constant 3.125000e-02 : f32
    %2 = vector.broadcast %cst : f32 to vector<32x1xf32>
    %cst_2 = arith.constant dense<0.000000e+00> : vector<16x1xf32>
    %3 = tpu.matmul %1, %2, %cst_2 {dimension_numbers = #tpu.dot_dimension_numbers<[1], [0], [0], [1], [0, 0, 1, 1], [], []>} : vector<16x32xf32>, vector<32x1xf32>, vector<16x1xf32> -> vector<16x1xf32>
    %4 = vector.broadcast %3 : vector<16x1xf32> to vector<16x32xf32>
    %5 = arith.subf %1, %4 : vector<16x32xf32>
    %6 = arith.mulf %5, %5 : vector<16x32xf32>
    %cst_3 = arith.constant dense<0.000000e+00> : vector<16x1xf32>
    %7 = tpu.matmul %6, %2, %cst_3 {dimension_numbers = #tpu.dot_dimension_numbers<[1], [0], [0], [1], [0, 0, 1, 1], [], []>} : vector<16x32xf32>, vector<32x1xf32>, vector<16x1xf32> -> vector<16x1xf32>
    %cst_4 = arith.constant 9.99999996E-13 : f32
    %8 = vector.broadcast %cst_4 : f32 to vector<16x1xf32>
    %9 = arith.addf %7, %8 : vector<16x1xf32>
    %10 = math.rsqrt %9 : vector<16x1xf32>
    %11 = vector.broadcast %10 : vector<16x1xf32> to vector<16x32xf32>
    %12 = arith.mulf %5, %11 : vector<16x32xf32>
    %c0_5 = arith.constant 0 : index
    %c0_6 = arith.constant 0 : index
    %c0_7 = arith.constant 0 : index
    %13 = vector.load %arg2[%c0_5, %c0_6, %c0_7] : memref<2x1x32xf32, #tpu.memory_space<vmem>>, vector<2x1x32xf32>
    %14 = vector.shape_cast %12 : vector<16x32xf32> to vector<2x8x32xf32>
    %15 = vector.broadcast %13 : vector<2x1x32xf32> to vector<2x8x32xf32>
    %16 = arith.mulf %15, %14 : vector<2x8x32xf32>
    %c0_8 = arith.constant 0 : index
    %c0_9 = arith.constant 0 : index
    %c0_10 = arith.constant 0 : index
    %17 = vector.load %arg3[%c0_8, %c0_9, %c0_10] : memref<2x1x32xf32, #tpu.memory_space<vmem>>, vector<2x1x32xf32>
    %18 = vector.broadcast %17 : vector<2x1x32xf32> to vector<2x8x32xf32>
    %19 = arith.addf %16, %18 : vector<2x8x32xf32>
    %20 = vector.shape_cast %19 : vector<2x8x32xf32> to vector<16x32xf32>
    %c0_11 = arith.constant 0 : index
    %c0_12 = arith.constant 0 : index
    %21 = vector.load %arg4[%c0_11, %c0_12] : memref<2x32xf32, #tpu.memory_space<vmem>>, vector<2x32xf32>
    %cst_13 = arith.constant dense<0.000000e+00> : vector<2x16xf32>
    %22 = tpu.matmul %21, %1, %cst_13 {dimension_numbers = #tpu.dot_dimension_numbers<[1], [1], [0], [0], [0, 0, 1, 0], [], []>} : vector<2x32xf32>, vector<16x32xf32>, vector<2x16xf32> -> vector<2x16xf32>
    %c0_14 = arith.constant 0 : index
    %c0_15 = arith.constant 0 : index
    %23 = vector.load %arg5[%c0_14, %c0_15] : memref<2x32xf32, #tpu.memory_space<vmem>>, vector<2x32xf32>
    %cst_16 = arith.constant dense<0.000000e+00> : vector<2x16xf32>
    %24 = tpu.matmul %23, %20, %cst_16 {dimension_numbers = #tpu.dot_dimension_numbers<[1], [1], [0], [0], [0, 0, 1, 0], [], []>} : vector<2x32xf32>, vector<16x32xf32>, vector<2x16xf32> -> vector<2x16xf32>
    %c0_17 = arith.constant 0 : index
    %c0_18 = arith.constant 0 : index
    %25 = vector.load %arg6[%c0_17, %c0_18] : memref<2x1xf32, #tpu.memory_space<vmem>>, vector<2x1xf32>
    %26 = vector.broadcast %25 : vector<2x1xf32> to vector<2x16xf32>
    %27 = arith.addf %22, %26 : vector<2x16xf32>
    %28 = arith.negf %27 : vector<2x16xf32>
    %29 = math.exp %28 : vector<2x16xf32>
    %cst_19 = arith.constant 1.000000e+00 : f32
    %30 = vector.broadcast %cst_19 : f32 to vector<2x16xf32>
    %31 = arith.addf %30, %29 : vector<2x16xf32>
    %32 = arith.divf %30, %31 : vector<2x16xf32>
    %c0_20 = arith.constant 0 : index
    %c0_21 = arith.constant 0 : index
    %33 = vector.load %arg8[%c0_20, %c0_21] : memref<2x16xf32, #tpu.memory_space<vmem>>, vector<2x16xf32>
    tpu.vector_store %arg8[%c0_20, %c0_21], %32 {strides = array<i32>} : memref<2x16xf32, #tpu.memory_space<vmem>>, vector<2x16xf32>,
    %c0_22 = arith.constant 0 : index
    %c0_23 = arith.constant 0 : index
    %34 = vector.load %arg7[%c0_22, %c0_23] : memref<2x1xf32, #tpu.memory_space<vmem>>, vector<2x1xf32>
    %35 = vector.broadcast %34 : vector<2x1xf32> to vector<2x16xf32>
    %36 = arith.addf %24, %35 : vector<2x16xf32>
    %37 = arith.negf %36 : vector<2x16xf32>
    %38 = math.exp %37 : vector<2x16xf32>
    %cst_24 = arith.constant 1.000000e+00 : f32
    %39 = vector.broadcast %cst_24 : f32 to vector<2x16xf32>
    %40 = arith.addf %39, %38 : vector<2x16xf32>
    %41 = arith.divf %39, %40 : vector<2x16xf32>
    %c0_25 = arith.constant 0 : index
    %c0_26 = arith.constant 0 : index
    %42 = vector.load %arg9[%c0_25, %c0_26] : memref<2x16xf32, #tpu.memory_space<vmem>>, vector<2x16xf32>
    tpu.vector_store %arg9[%c0_25, %c0_26], %41 {strides = array<i32>} : memref<2x16xf32, #tpu.memory_space<vmem>>, vector<2x16xf32>,
    return
  }
  func.func @transform_0(%arg0: i32) -> (i32, i32, i32) {
    %c0_i32 = arith.constant 0 : i32
    %c0_i32_0 = arith.constant 0 : i32
    %c0_i32_1 = arith.constant 0 : i32
    return %arg0, %c0_i32, %c0_i32_0 : i32, i32, i32
  }
  func.func @transform_1(%arg0: i32) -> (i32, i32, i32) {
    %c0_i32 = arith.constant 0 : i32
    %c0_i32_0 = arith.constant 0 : i32
    %c0_i32_1 = arith.constant 0 : i32
    return %arg0, %c0_i32, %c0_i32_0 : i32, i32, i32
  }
  func.func @transform_2(%arg0: i32) -> (i32, i32, i32) {
    %c0_i32 = arith.constant 0 : i32
    %c0_i32_0 = arith.constant 0 : i32
    %c0_i32_1 = arith.constant 0 : i32
    return %arg0, %c0_i32, %c0_i32_0 : i32, i32, i32
  }
  func.func @transform_3(%arg0: i32) -> (i32, i32) {
    %c0_i32 = arith.constant 0 : i32
    %c0_i32_0 = arith.constant 0 : i32
    %c0_i32_1 = arith.constant 0 : i32
    return %c0_i32, %c0_i32_0 : i32, i32
  }
  func.func @transform_4(%arg0: i32) -> (i32, i32) {
    %c0_i32 = arith.constant 0 : i32
    %c0_i32_0 = arith.constant 0 : i32
    %c0_i32_1 = arith.constant 0 : i32
    return %c0_i32, %c0_i32_0 : i32, i32
  }
  func.func @transform_5(%arg0: i32) -> (i32, i32) {
    %c0_i32 = arith.constant 0 : i32
    %c0_i32_0 = arith.constant 0 : i32
    %c0_i32_1 = arith.constant 0 : i32
    return %c0_i32, %c0_i32_0 : i32, i32
  }
  func.func @transform_6(%arg0: i32) -> (i32, i32) {
    %c0_i32 = arith.constant 0 : i32
    %c0_i32_0 = arith.constant 0 : i32
    %c0_i32_1 = arith.constant 0 : i32
    return %c0_i32, %c0_i32_0 : i32, i32
  }
  func.func @transform_7(%arg0: i32) -> (i32, i32) {
    %c0_i32 = arith.constant 0 : i32
    %c0_i32_0 = arith.constant 0 : i32
    return %c0_i32, %arg0 : i32, i32
  }
  func.func @transform_8(%arg0: i32) -> (i32, i32) {
    %c0_i32 = arith.constant 0 : i32
    %c0_i32_0 = arith.constant 0 : i32
    return %c0_i32, %arg0 : i32, i32
  }
}

</mosaic_0001>

<bundles_post_ra>
// kernel: tpu_custom_call.1
= control target key start
LH: loop header
LB: loop body
LE: loop exit
PB: predicated region body
PF: predicated region fallthrough
CT: control target
= control target key end

     0   :  { %14 = vsyncpa [#allocation3], 0  ;;  %s1080_s0 = inlined_call_operand.hbm [shape: f32[2,8,32], index: 0, kind: input, shape index: {}]   ;;  %s1081_s1 = inlined_call_operand.hbm [shape: f32[2,1,32], index: 1, kind: input, shape index: {}]   ;;  %s1082_s2 = inlined_call_operand.hbm [shape: f32[2,1,32], index: 2, kind: input, shape index: {}]   ;;  %s1083_s3 = inlined_call_operand.hbm [shape: f32[2,32], index: 3, kind: input, shape index: {}]   ;;  %s1084_s4 = inlined_call_operand.hbm [shape: f32[2,32], index: 4, kind: input, shape index: {}]   ;;  %s1085_s5 = inlined_call_operand.hbm [shape: f32[2,1], index: 5, kind: input, shape index: {}]   ;;  %s1086_s6 = inlined_call_operand.hbm [shape: f32[2,1], index: 6, kind: input, shape index: {}]   ;;  %s1087_s7 = inlined_call_operand.hbm [shape: f32[2,16], index: 7, kind: output, shape index: {0}]   ;;  %s1088_s8 = inlined_call_operand.hbm [shape: f32[2,16], index: 8, kind: output, shape index: {1}]  }
   0x1   :  { %15 = vsyncpa [#allocation6], 0 }
   0x2   :  { %16 = vsyncpa [#allocation9], 0 }
   0x3   :  { %17 = vsyncpa [#allocation12], 0 }
   0x4   :  { %18 = vsyncpa [#allocation4], 0 }
   0x5   :  { %19 = vsyncpa [#allocation16], 0  ;;  %s883_s27 = smov [#allocation5]   ;;  %s673_s9 = scalar_lea.hbm %s1081_s1, 32 }
   0x6   :  { %s37_s28 = sshll.u32 %s883_s27, 4  ;;  %p674_p0 = scmp.ne.s32.totalorder %s1081_s1, %s673_s9  ;;  %s38_s28 = int_to_ptr.vmem [resolvable:$true] %s37_s28 }
   0x7   :  { %p677_p1 = scmp.lt.u32.totalorder %s673_s9, %s1081_s1 }
   0x9   :  { %p679_p2 = pnand %p677_p1, %p674_p0 }
   0xb   :  { %682 = shalt.err (!%p679_p2)
}
   0xc   :  { %s683_s14 = scalar_lea.vmem %s38_s28, 32  ;;  %p688_p4 = scmp.lt.s32.totalorder %s38_s28, %s38_s28 }
   0xd   :  { %p684_p3 = scmp.ne.s32.totalorder %s38_s28, %s683_s14  ;;  %p689_p5 = scmp.lt.s32.totalorder %s683_s14, %s683_s14 }
   0xf   :  { %p690_p6 = por %p689_p5, %p688_p4 }
  0x11   :  { %p691_p7 = pnand %p690_p6, %p684_p3 }
  0x13   :  { %694 = shalt.err (!%p691_p7)
}
  0x14   :  { %s884_s15 = smov 16   ;;  %s885_s16 = smov 1  }
  0x15   :  { %43 = dma.hbm_to_vmem [thread:$0]  %s1081_s1, 32, %s38_s28, [#allocation6], %s884_s15, %s884_s15, %s885_s16  }
  0x16   :  { %s886_s19 = smov [#allocation8]   ;;  %s887_s21 = smov [#allocation11]  }
  0x17   :  { %s62_s20 = sshll.u32 %s886_s19, 4  ;;  %s82_s22 = sshll.u32 %s887_s21, 4  ;;  %s63_s20 = int_to_ptr.vmem [resolvable:$true] %s62_s20  ;;  %s83_s22 = int_to_ptr.vmem [resolvable:$true] %s82_s22 }
  0x18   :  { %s695_s25 = scalar_lea.hbm %s1083_s3, 32 }
  0x19   :  { %p696_p8 = scmp.ne.s32.totalorder %s1083_s3, %s695_s25  ;;  %p699_p9 = scmp.lt.u32.totalorder %s695_s25, %s1083_s3 }
  0x1b   :  { %p701_p10 = pnand %p699_p9, %p696_p8 }
  0x1d   :  { %704 = shalt.err (!%p701_p10)
}
  0x1e   :  { %s705_s1 = scalar_lea.vmem %s63_s20, 32  ;;  %p710_p12 = scmp.lt.s32.totalorder %s63_s20, %s63_s20 }
  0x1f   :  { %p706_p11 = scmp.ne.s32.totalorder %s63_s20, %s705_s1  ;;  %p711_p13 = scmp.lt.s32.totalorder %s705_s1, %s705_s1 }
  0x21   :  { %p712_p0 = por %p711_p13, %p710_p12 }
  0x23   :  { %p713_p1 = pnand %p712_p0, %p706_p11 }
  0x25   :  { %716 = shalt.err (!%p713_p1)
}
  0x26   :  { %65 = dma.hbm_to_vmem [thread:$0]  %s1083_s3, 32, %s63_s20, [#allocation9]  }
  0x27   :  { %s717_s12 = scalar_lea.hbm %s1085_s5, 32 }
  0x28   :  { %p718_p2 = scmp.ne.s32.totalorder %s1085_s5, %s717_s12  ;;  %p721_p3 = scmp.lt.u32.totalorder %s717_s12, %s1085_s5 }
  0x2a   :  { %p723_p4 = pnand %p721_p3, %p718_p2 }
  0x2c   :  { %726 = shalt.err (!%p723_p4)
}
  0x2d   :  { %s727_s19 = scalar_lea.vmem %s83_s22, 32  ;;  %p732_p6 = scmp.lt.s32.totalorder %s83_s22, %s83_s22 }
  0x2e   :  { %p728_p5 = scmp.ne.s32.totalorder %s83_s22, %s727_s19  ;;  %p733_p7 = scmp.lt.s32.totalorder %s727_s19, %s727_s19 }
  0x30   :  { %p734_p8 = por %p733_p7, %p732_p6 }
  0x32   :  { %p735_p9 = pnand %p734_p8, %p728_p5 }
  0x34   :  { %738 = shalt.err (!%p735_p9)
}
  0x35   :  { %85 = dma.hbm_to_vmem [thread:$0]  %s1085_s5, 32, %s83_s22, [#allocation12]  }
  0x36   :  { %s888_s21 = smov [#allocation2]   ;;  %s739_s26 = scalar_lea.hbm %s1080_s0, 256 }
  0x37   :  { %s25_s23 = sshll.u32 %s888_s21, 4  ;;  %p740_p10 = scmp.ne.s32.totalorder %s1080_s0, %s739_s26  ;;  %s26_s23 = int_to_ptr.vmem [resolvable:$true] %s25_s23 }
  0x38   :  { %p743_p11 = scmp.lt.u32.totalorder %s739_s26, %s1080_s0 }
  0x3a   :  { %p745_p12 = pnand %p743_p11, %p740_p10 }
  0x3c   :  { %748 = shalt.err (!%p745_p12)
}
  0x3d   :  { %s749_s28 = scalar_lea.vmem %s26_s23, 256  ;;  %p754_p0 = scmp.lt.s32.totalorder %s26_s23, %s26_s23 }
  0x3e   :  { %p750_p13 = scmp.ne.s32.totalorder %s26_s23, %s749_s28  ;;  %p755_p1 = scmp.lt.s32.totalorder %s749_s28, %s749_s28 }
  0x40   :  { %p756_p2 = por %p755_p1, %p754_p0 }
  0x42   :  { %p757_p3 = pnand %p756_p2, %p750_p13 }
  0x44   :  { %760 = shalt.err (!%p757_p3)
}
  0x45   :  { %s889_s5 = smov 128   ;;  %s890_s22 = smov 8  }
  0x46   :  { %31 = dma.hbm_to_vmem [thread:$0]  %s1080_s0, 256, %s26_s23, [#allocation3], %s889_s5, %s889_s5, %s890_s22  }
  0x47   :  { %s891_s11 = smov [#allocation7]   ;;  %s892_s13 = smov [#allocation10]  }
  0x48   :  { %s49_s12 = sshll.u32 %s891_s11, 4  ;;  %s72_s14 = sshll.u32 %s892_s13, 4  ;;  %s50_s12 = int_to_ptr.vmem [resolvable:$true] %s49_s12  ;;  %s73_s14 = int_to_ptr.vmem [resolvable:$true] %s72_s14 }
  0x49   :  { %s761_s19 = scalar_lea.hbm %s1082_s2, 32 }
  0x4a   :  { %p762_p4 = scmp.ne.s32.totalorder %s1082_s2, %s761_s19  ;;  %p765_p5 = scmp.lt.u32.totalorder %s761_s19, %s1082_s2 }
  0x4c   :  { %p767_p6 = pnand %p765_p5, %p762_p4 }
  0x4e   :  { %770 = shalt.err (!%p767_p6)
}
  0x4f   :  { %s771_s0 = scalar_lea.vmem %s50_s12, 32  ;;  %p776_p8 = scmp.lt.s32.totalorder %s50_s12, %s50_s12 }
  0x50   :  { %p772_p7 = scmp.ne.s32.totalorder %s50_s12, %s771_s0  ;;  %p777_p9 = scmp.lt.s32.totalorder %s771_s0, %s771_s0 }
  0x52   :  { %p778_p10 = por %p777_p9, %p776_p8 }
  0x54   :  { %p779_p11 = pnand %p778_p10, %p772_p7 }
  0x56   :  { %782 = shalt.err (!%p779_p11)
}
  0x57   :  { %55 = dma.hbm_to_vmem [thread:$0]  %s1082_s2, 32, %s50_s12, [#allocation6], %s884_s15, %s884_s15, %s885_s16  }
  0x58   :  { %s783_s29 = scalar_lea.hbm %s1084_s4, 32 }
  0x59   :  { %p784_p12 = scmp.ne.s32.totalorder %s1084_s4, %s783_s29  ;;  %p787_p13 = scmp.lt.u32.totalorder %s783_s29, %s1084_s4 }
  0x5b   :  { %p789_p0 = pnand %p787_p13, %p784_p12 }
  0x5d   :  { %792 = shalt.err (!%p789_p0)
}
  0x5e   :  { %s793_s22 = scalar_lea.vmem %s73_s14, 32  ;;  %p798_p2 = scmp.lt.s32.totalorder %s73_s14, %s73_s14 }
  0x5f   :  { %p794_p1 = scmp.ne.s32.totalorder %s73_s14, %s793_s22  ;;  %p799_p3 = scmp.lt.s32.totalorder %s793_s22, %s793_s22 }
  0x61   :  { %p800_p4 = por %p799_p3, %p798_p2 }
  0x63   :  { %p801_p5 = pnand %p800_p4, %p794_p1 }
  0x65   :  { %804 = shalt.err (!%p801_p5)
}
  0x66   :  { %75 = dma.hbm_to_vmem [thread:$0]  %s1084_s4, 32, %s73_s14, [#allocation9]  }
  0x67   :  { %s893_s16 = smov [#allocation13]   ;;  %s805_s12 = scalar_lea.hbm %s1086_s6, 32 }
  0x68   :  { %s92_s9 = sshll.u32 %s893_s16, 4  ;;  %p806_p6 = scmp.ne.s32.totalorder %s1086_s6, %s805_s12  ;;  %s93_s9 = int_to_ptr.vmem [resolvable:$true] %s92_s9 }
  0x69   :  { %p809_p7 = scmp.lt.u32.totalorder %s805_s12, %s1086_s6 }
  0x6b   :  { %p811_p8 = pnand %p809_p7, %p806_p6 }
  0x6d   :  { %814 = shalt.err (!%p811_p8)
}
  0x6e   :  { %s815_s3 = scalar_lea.vmem %s93_s9, 32  ;;  %p820_p10 = scmp.lt.s32.totalorder %s93_s9, %s93_s9 }
  0x6f   :  { %p816_p9 = scmp.ne.s32.totalorder %s93_s9, %s815_s3  ;;  %p821_p11 = scmp.lt.s32.totalorder %s815_s3, %s815_s3 }
  0x71   :  { %p822_p12 = por %p821_p11, %p820_p10 }
  0x73   :  { %p823_p13 = pnand %p822_p12, %p816_p9 }
  0x75   :  { %826 = shalt.err (!%p823_p13)
}
  0x76   :  { %95 = dma.hbm_to_vmem [thread:$0]  %s1086_s6, 32, %s93_s9, [#allocation12]  }
  0x77   :  { %871 = dma.done.wait [#allocation3], 256  }
  0x78   :  { %872 = vsyncadd [#allocation3], 4294967040 }
  0x79   :  { %873 = dma.done.wait [#allocation6], 64  }
  0x7a   :  { %874 = vsyncadd [#allocation6], 4294967232 }
  0x7b   :  { %875 = dma.done.wait [#allocation9], 64  }
  0x7c   :  { %876 = vsyncadd [#allocation9], 4294967232 }
  0x7d   :  { %877 = dma.done.wait [#allocation12], 64  }
  0x7e   :  { %878 = vsyncadd [#allocation12], 4294967232  ;;  %v894_v0 = vmov 0.03125|0.03125   ;;  %vm119_vm0 = vcmask 261120   ;;  %v117_v1 = vld [vmem:[#allocation2] sm:$0xff] }
  0x7f   :  { %625 = vmatprep.subr.bf16.mxu0 %v894_v0  ;;  %629 = vmatprep.subr.bf16.mxu1 %v894_v0  ;;  %v118_v2 = vld [vmem:[#allocation2 + $0x8] sm:$0xff]  ;;  %v895_v3 = vmov 0.0|0.0   ;;  %vm896_vm1 = vmmov 0   ;;  %v897_v4 = vmov 0.0   ;;  %vm1041_vm2 = vmpackc.low %vm119_vm0, %vm119_vm0  ;;  %v342_v7 = vld [vmem:[#allocation8] sm:$0x3] }
  0x80   :  { %626 = vmatpush3.bf16.msra.mxu0 %v894_v0  ;;  %630 = vmatpush3.bf16.msra.mxu1 %v894_v0  ;;  %v634_v5 = vpack.c.bf16 %v118_v2, %v117_v1  ;;  %v898_v8 = vmov 0   ;;  %v344_v11 = vld [vmem:[#allocation11] sm:$0x3]  ;;  %vm429_vm3 = vcmask 123904   ;;  %v431_v32 = vld [vmem:[#allocation13] sm:$0x3] }
  0x81   :  { %627 = vmatprep.subr.bf16.mxu0 %v894_v0  ;;  %631 = vmatprep.subr.bf16.mxu1 %v894_v0  ;;  %v559_v35 = vld [vmem:[#allocation5] ss:$0 sm:$0xff]  ;;  %v560_v36 = vld [vmem:[#allocation5 + $0x1] ss:$0 sm:$0xff]  ;;  %v561_v40 = vld [vmem:[#allocation7] ss:$0 sm:$0xff] }
  0x82   :  { %597 = vmatprep.mubr.msk.f32.mxu0 %vm119_vm0, %v117_v1  ;;  %659 = vset.pattern.permute.xlu0 %v898_v8  ;;  %v562_v41 = vld [vmem:[#allocation7 + $0x1] ss:$0 sm:$0xff]  ;;  %v343_v46 = vld [vmem:[#allocation10] sm:$0x3]  ;;  %s899_s6 = smov [#allocation14]  }
  0x83   :  { %660 = vset.pattern.permute.xlu1 %v898_v8  ;;  %s529_s20 = sshll.u32 %s899_s6, 4  ;;  %s530_s20 = int_to_ptr.vmem [resolvable:$true] %s529_s20 }
  0x84   :  { %628 = vmatpush3.bf16.msra.mxu0 %v894_v0  ;;  %632 = vmatpush3.bf16.msra.mxu1 %v894_v0  ;;  %s827_s21 = scalar_lea.vmem %s530_s20, 32  ;;  %p832_p1 = scmp.lt.s32.totalorder %s530_s20, %s530_s20 }
  0x85   :  { %633 = vmatprep.subr.bf16.mxu0 %v895_v3  ;;  %637 = vmatprep.subr.bf16.mxu1 %v895_v3  ;;  %p828_p0 = scmp.ne.s32.totalorder %s530_s20, %s827_s21  ;;  %p833_p2 = scmp.lt.s32.totalorder %s827_s21, %s827_s21 }
  0x87   :  { %598 = vmatmul.mubr.msk.f32.vlgmr.msra.gmra.mrb[0].mxu0 %vm119_vm0, %v118_v2  ;;  %p834_p3 = por %p833_p2, %p832_p1 }
  0x88   :  { %615 = vmatprep.mubr.msk.f32.mxu0 %vm896_vm1, %v897_v4 }
  0x89   :  { %p835_p4 = pnand %p834_p3, %p828_p0 }
  0x8d   :  { %636 = vmatpush3.bf16.xpose.msk.msra.mxu0 %vm1041_vm2, %v634_v5 }
  0x94   :  { %616 = vmatmul.mubr.msk.f32.vlgmr.msra.gmra.mrb[2].mxu0 %vm119_vm0, %v342_v7 }
 0x15a   :  { %v599_v9 = vpop.f32.mrb[0].mxu0 }
 0x15b   :  { %v192_v10 = vpop.f32.mrb[1].mxu0 }
 0x15c   :  { %203 = vperm.xlu0 %659, %v192_v10  }
 0x160   :  { %208 = vperm.xlu0 %659, %v599_v9  }
 0x164   :  { %347 = vperm.xlu0 %659, %v344_v11  }
 0x167   :  { %v419_v12 = vpop.f32.mrb[2].mxu0 }
 0x168   :  { %v617_v13 = vpop.f32.mrb[3].mxu0 }
 0x1db   :  { %v204_v14 = vpop.permute.xlu0 %203 }
 0x1dc   :  { %v211_v15 = vsub.f32 %v117_v1, %v204_v14 }
 0x1de   :  { %v213_v16 = vmul.f32 %v211_v15, %v211_v15 }
 0x1df   :  { %v209_v17 = vpop.permute.xlu0 %208 }
 0x1e0   :  { %v212_v18 = vsub.f32 %v118_v2, %v209_v17  ;;  %608 = vmatprep.mubr.msk.f32.mxu1 %vm119_vm0, %v213_v16 }
 0x1e2   :  { %v214_v19 = vmul.f32 %v212_v18, %v212_v18 }
 0x1e3   :  { %v348_v20 = vpop.permute.xlu0 %347 }
 0x1e4   :  { %v420_v21 = vadd.f32 %v419_v12, %v348_v20  ;;  %609 = vmatmul.mubr.msk.f32.vlgmr.msra.gmra.mrb[0].mxu1 %vm119_vm0, %v214_v19 }
 0x1e5   :  { %622 = vmatprep.mubr.msk.f32.mxu1 %vm896_vm1, %v897_v4 }
 0x1e6   :  { %v566_v22 = vmul.f32 -1.442695, %v420_v21 }
 0x1e8   :  { %661 = vpow2.f32 %v566_v22 }
 0x1f2   :  { %v662_v23 = vpop.eup %661 }
 0x1f3   :  { %v426_v24 = vadd.f32 1.0, %v662_v23 }
 0x1f5   :  { %663 = vrcp.f32 %v426_v24 }
 0x1ff   :  { %v664_v25 = vpop.eup %663 }
 0x200   :  { %430 = vst.msk [vmem:[#allocation14] sm:$0x3] %vm429_vm3, %v664_v25 }
 0x2b7   :  { %v610_v26 = vpop.f32.mrb[0].mxu1 }
 0x2b8   :  { %v287_v27 = vpop.f32.mrb[1].mxu1  ;;  %v293_v29 = vadd.f32 1e-12, %v610_v26 }
 0x2b9   :  { %v288_v28 = vadd.f32 1e-12, %v287_v27 }
 0x2bb   :  { %665 = vrsqrt.f32 %v288_v28 }
 0x2bc   :  { %667 = vrsqrt.f32 %v293_v29 }
 0x2c5   :  { %v666_v30 = vpop.eup %665 }
 0x2c6   :  { %300 = vperm.xlu1 %660, %v666_v30   ;;  %v668_v31 = vpop.eup %667 }
 0x2ca   :  { %305 = vperm.xlu1 %660, %v668_v31  }
 0x2ce   :  { %434 = vperm.xlu1 %660, %v431_v32  }
 0x345   :  { %v301_v33 = vpop.permute.xlu1 %300 }
 0x346   :  { %v308_v34 = vmul.f32 %v301_v33, %v211_v15 }
 0x348   :  { %v324_v38 = vmul.f32 %v559_v35, %v308_v34 }
 0x349   :  { %v306_v37 = vpop.permute.xlu1 %305 }
 0x34a   :  { %v309_v39 = vmul.f32 %v306_v37, %v212_v18  ;;  %v340_v43 = vadd.f32 %v561_v40, %v324_v38 }
 0x34c   :  { %v325_v42 = vmul.f32 %v560_v36, %v309_v39 }
 0x34e   :  { %v341_v44 = vadd.f32 %v562_v41, %v325_v42 }
 0x350   :  { %v638_v45 = vpack.c.bf16 %v341_v44, %v340_v43 }
 0x352   :  { %640 = vmatpush3.bf16.xpose.msk.msra.mxu1 %vm1041_vm2, %v638_v45 }
 0x359   :  { %623 = vmatmul.mubr.msk.f32.vlgmr.msra.gmra.mrb[2].mxu1 %vm119_vm0, %v343_v46 }
 0x35a   :  { %838 = shalt.err (!%p835_p4)
}
 0x35b   :  { %s839_s23 = scalar_lea.hbm %s1087_s7, 32 }
 0x35c   :  { %p840_p5 = scmp.ne.s32.totalorder %s1087_s7, %s839_s23  ;;  %p843_p6 = scmp.lt.u32.totalorder %s839_s23, %s1087_s7 }
 0x35e   :  { %p845_p7 = pnand %p843_p6, %p840_p5 }
 0x360   :  { %848 = shalt.err (!%p845_p7)
}
 0x361   :  { %532 = dma.vmem_to_hbm [thread:$0]  %s530_s20, 32, %s1087_s7, [#allocation4]   ;;  %v435_v47 = vpop.permute.xlu1 %434 }
 0x362   :  { %s900_s28 = smov [#allocation15]  }
 0x363   :  { %s539_s5 = sshll.u32 %s900_s28, 4  ;;  %s540_s5 = int_to_ptr.vmem [resolvable:$true] %s539_s5 }
 0x364   :  { %s849_s22 = scalar_lea.vmem %s540_s5, 32  ;;  %p854_p9 = scmp.lt.s32.totalorder %s540_s5, %s540_s5 }
 0x365   :  { %p850_p8 = scmp.ne.s32.totalorder %s540_s5, %s849_s22  ;;  %p855_p10 = scmp.lt.s32.totalorder %s849_s22, %s849_s22 }
 0x367   :  { %p856_p11 = por %p855_p10, %p854_p9 }
 0x369   :  { %p857_p12 = pnand %p856_p11, %p850_p8 }
 0x42c   :  { %v512_v48 = vpop.f32.mrb[2].mxu1 }
 0x42d   :  { %v513_v49 = vadd.f32 %v512_v48, %v435_v47  ;;  %v624_v50 = vpop.f32.mrb[3].mxu1 }
 0x42f   :  { %v570_v51 = vmul.f32 -1.442695, %v513_v49 }
 0x431   :  { %669 = vpow2.f32 %v570_v51 }
 0x43b   :  { %v670_v52 = vpop.eup %669 }
 0x43c   :  { %v519_v53 = vadd.f32 1.0, %v670_v52 }
 0x43e   :  { %671 = vrcp.f32 %v519_v53 }
 0x448   :  { %v672_v54 = vpop.eup %671 }
 0x449   :  { %522 = vst.msk [vmem:[#allocation15] sm:$0x3] %vm429_vm3, %v672_v54 }
 0x44a   :  { %860 = shalt.err (!%p857_p12)
}
 0x44b   :  { %s861_s15 = scalar_lea.hbm %s1088_s8, 32 }
 0x44c   :  { %p862_p13 = scmp.ne.s32.totalorder %s1088_s8, %s861_s15  ;;  %p865_p0 = scmp.lt.u32.totalorder %s861_s15, %s1088_s8 }
 0x44e   :  { %p867_p1 = pnand %p865_p0, %p862_p13 }
 0x450   :  { %870 = shalt.err (!%p867_p1)
}
 0x451   :  { %542 = dma.vmem_to_hbm [thread:$0]  %s540_s5, 32, %s1088_s8, [#allocation16]  }
 0x452   :  { %879 = dma.done.wait [#allocation4], 32  }
 0x453   :  { %880 = vsyncadd [#allocation4], 4294967264 }
 0x454   :  { %881 = dma.done.wait [#allocation16], 32  }
 0x455   :  { %882 = vsyncadd [#allocation16], 4294967264 }
 0x456   :  { %549 = vsyncpa [#allocation3], 1 }
 0x457   :  { %550 = vsyncpa [#allocation6], 1 }
 0x458   :  { %551 = vsyncpa [#allocation9], 1 }
 0x459   :  { %552 = vsyncpa [#allocation12], 1 }
 0x45a   :  { %553 = vsyncpa [#allocation4], 1 }
 0x45b   :  { %554 = vsyncpa [#allocation16], 1 }

</bundles_post_ra>
